<compile_context>
chip_gen: v7x
topology: tpu7x:2x2x1
jax: 0.10.0
libtpu: 0.0.40
codegen_flags: <defaults>
</compile_context>

<pallas_src>
import functools

import jax
import jax.numpy as jnp
from jax.experimental import pallas as pl
from jax.experimental.pallas import tpu as pltpu


def _tcoder_phase_kernel(x_ref, t_ref, freq_ref, o_ref, *, half):
    """Positional-phase encoding + residual add for one (Bb, F, TT) tile.

    x_ref    : (Bb, F, TT)  input features
    t_ref    : (Bb, 1, TT)  event times for this tile (f32)
    freq_ref : (1,  L, 1)   100 * pow_vec_reci  (VMEM-resident)
    o_ref    : (Bb, F, TT)  output
    """
    phase = t_ref[...] * freq_ref[...]                     # (Bb, L, TT) f32
    x = x_ref[...]
    o_ref[:, :half, :] = (x[:, :half, :] + jnp.sin(phase)).astype(o_ref.dtype)
    o_ref[:, half:, :] = (x[:, half:, :] + jnp.cos(phase)).astype(o_ref.dtype)


def _vmem_plan():
    """Per-generation (per_tile_budget_bytes, vmem_limit_bytes)."""
    vmem_cap = 64 * 1024 * 1024  # conservative default = v7x per-TC VMEM
    try:
        info = pltpu.get_tpu_info()
        vmem_cap = int(getattr(info, "vmem_capacity_bytes", vmem_cap))
    except Exception:
        pass
    if vmem_cap >= 100 * 1024 * 1024:
        # v5e / v6e: 128 MiB physical.  4x (x+out double buffers) ~= 20 MiB.
        return 5 * 1024 * 1024, 64 * 1024 * 1024
    # v7x: 64 MiB physical per TC.  Keep pipelined blocks <= ~14 MiB.
    return 3 * 1024 * 1024 + 512 * 1024, 48 * 1024 * 1024


def _choose_tiles(B, F, T, itemsize, tile_budget_bytes):
    """Pick (Bb, TT): lane-dense time tile plus batch blocking."""
    max_tt = max(128, tile_budget_bytes // (F * itemsize))
    if T % 128 == 0:
        tt = 128
        for cand in (2048, 1024, 512, 256, 128):
            if cand <= max_tt and T % cand == 0:
                tt = cand
                break
    elif T <= min(max_tt, 2048):
        tt = T  # full-extent block: always a legal (8,128)-rule shape
    else:
        # Ragged T: tile must still be a multiple of 128; last block is masked.
        tt = max(128, min(2048, (max_tt // 128) * 128))
    n_t = pl.cdiv(T, tt)

    # Batch blocking: amortize per-step overhead when tiles are small, but keep
    # >= 2 grid steps when possible so both v7x TensorCores get work.
    target = min(tile_budget_bytes, 4 * 1024 * 1024)
    bb = 1
    for cand in range(2, B + 1):
        if B % cand:
            continue
        if cand * F * tt * itemsize > target:
            break
        if (B // cand) * n_t < 2 and B * n_t >= 2:
            break
        bb = cand
    return bb, tt


def temporal_coder_phase(x, times, feat_size, *, donate_x=False):
    """x: (B, feat_size, T); times: (B, ...) flattened to (B, T)."""
    B, F, T = x.shape
    assert F == feat_size and feat_size % 2 == 0
    L = feat_size // 2

    # Deterministic "parameters" (match the PyTorch __init__), with the 100x
    # scale folded in so the kernel does one multiply per phase element.
    b = jnp.arange(L, dtype=jnp.float32)
    pow_vec_reci = 1.0 / jnp.power(1000.0, b / float(feat_size))
    freq = (100.0 * pow_vec_reci).reshape(1, L, 1)

    times3 = times.reshape(B, -1).astype(jnp.float32)
    assert times3.shape[1] == T
    times3 = times3.reshape(B, 1, T)

    itemsize = jnp.dtype(x.dtype).itemsize
    tile_budget, vmem_limit = _vmem_plan()
    Bb, TT = _choose_tiles(B, F, T, itemsize, tile_budget)
    grid = (B // Bb, pl.cdiv(T, TT))

    kernel = functools.partial(_tcoder_phase_kernel, half=L)

    # sin/cos lower to VPU range-reduction + polynomial; the transcendentals
    # field is advisory only.
    cost = pl.CostEstimate(
        flops=B * T * (L + F),
        transcendentals=B * F * T,
        bytes_accessed=itemsize * 2 * B * F * T + 4 * B * T,
    )

    return pl.pallas_call(
        kernel,
        out_shape=jax.ShapeDtypeStruct((B, F, T), x.dtype),
        grid=grid,
        in_specs=[
            pl.BlockSpec((Bb, F, TT), lambda bi, ti: (bi, 0, ti)),   # x
            pl.BlockSpec((Bb, 1, TT), lambda bi, ti: (bi, 0, ti)),   # times
            pl.BlockSpec((1, L, 1), lambda bi, ti: (0, 0, 0)),       # freq (resident)
        ],
        out_specs=pl.BlockSpec((Bb, F, TT), lambda bi, ti: (bi, 0, ti)),
        compiler_params=pltpu.CompilerParams(
            dimension_semantics=("parallel", "parallel"),
            vmem_limit_bytes=vmem_limit),
        cost_estimate=cost,
        input_output_aliases={0: 0} if donate_x else {},
    )(x, times3, freq)


def _reference(x, times, feat_size):
    """Pure-JAX mirror of the PyTorch forward, for correctness checking."""
    B = x.shape[0]
    L = feat_size // 2
    b = jnp.arange(L, dtype=jnp.float32)
    pow_vec_reci = 1.0 / jnp.power(1000.0, b / float(feat_size))
    t = times.reshape(B, -1, 1).astype(jnp.float32)            # (B, T, 1)
    pes = jnp.sin(100.0 * t * pow_vec_reci)                    # (B, T, L)
    pec = jnp.cos(100.0 * t * pow_vec_reci)                    # (B, T, L)
    pe = jnp.stack([pes, pec], axis=2).reshape(B, t.shape[1], 2 * L)
    return x + jnp.transpose(pe, (0, 2, 1))


if __name__ == "__main__":
    B, FEAT, T = 2, 32, 16
    key = jax.random.PRNGKey(0)
    kx, kt = jax.random.split(key)
    x = jax.random.normal(kx, (B, FEAT, T), dtype=jnp.float32)
    times = jax.random.uniform(kt, (B, T), dtype=jnp.float32) * 10.0

    out = jax.block_until_ready(temporal_coder_phase(x, times, FEAT))
    ref = _reference(x, times, FEAT)

    assert out.shape == (B, FEAT, T)
    # Kernel folds 100x into the frequency table (association-order change of
    # ~1 ulp in the phase) and uses Mosaic's sin/cos polynomials at |phase| up
    # to ~1e3; 2e-3 is generous for O(1) outputs.
    err = float(jnp.max(jnp.abs(out - ref)))
    assert bool(jnp.allclose(out, ref, atol=2e-3, rtol=2e-3)), err
    print("KERNEL_OK")
</pallas_src>

<mosaic_0001>
module attributes {stable_mosaic.version = 11 : i64} {
  func.func @_tcoder_phase_kernel(%arg0: i32, %arg1: i32, %arg2: memref<1x32x16xf32, #tpu.memory_space<vmem>>, %arg3: memref<1x1x16xf32, #tpu.memory_space<vmem>>, %arg4: memref<1x16x1xf32, #tpu.memory_space<vmem>>, %arg5: memref<1x32x16xf32, #tpu.memory_space<vmem>>) attributes {dimension_semantics = [#tpu.dimension_semantics<parallel>, #tpu.dimension_semantics<parallel>], iteration_bounds = array<i64: 2, 1>, scalar_prefetch = 0 : i64, scratch_operands = 0 : i64, tpu.core_type = #tpu.core_type<tc>, window_params = [{transform_indices = @transform_0, window_bounds = array<i64: 1, 32, 16>}, {transform_indices = @transform_1, window_bounds = array<i64: 1, 1, 16>}, {pipeline_mode = #tpu.pipeline_mode<synchronous>, transform_indices = @transform_2, window_bounds = array<i64: 1, 16, 1>}, {transform_indices = @transform_3, window_bounds = array<i64: 1, 32, 16>}]} {
    %c0 = arith.constant 0 : index
    %c0_0 = arith.constant 0 : index
    %c0_1 = arith.constant 0 : index
    %0 = vector.load %arg3[%c0, %c0_0, %c0_1] : memref<1x1x16xf32, #tpu.memory_space<vmem>>, vector<1x1x16xf32>
    %c0_2 = arith.constant 0 : index
    %c0_3 = arith.constant 0 : index
    %c0_4 = arith.constant 0 : index
    %1 = vector.load %arg4[%c0_2, %c0_3, %c0_4] : memref<1x16x1xf32, #tpu.memory_space<vmem>>, vector<1x16x1xf32>
    %2 = vector.broadcast %0 : vector<1x1x16xf32> to vector<1x16x16xf32>
    %3 = vector.broadcast %1 : vector<1x16x1xf32> to vector<1x16x16xf32>
    %4 = arith.mulf %2, %3 : vector<1x16x16xf32>
    %c0_5 = arith.constant 0 : index
    %c0_6 = arith.constant 0 : index
    %c0_7 = arith.constant 0 : index
    %5 = vector.load %arg2[%c0_5, %c0_6, %c0_7] : memref<1x32x16xf32, #tpu.memory_space<vmem>>, vector<1x32x16xf32>
    %6 = vector.extract_strided_slice %5 {offsets = [0, 0, 0], sizes = [1, 16, 16], strides = [1, 1, 1]} : vector<1x32x16xf32> to vector<1x16x16xf32>
    %7 = math.sin %4 : vector<1x16x16xf32>
    %8 = arith.addf %6, %7 : vector<1x16x16xf32>
    %c0_8 = arith.constant 0 : index
    %c0_9 = arith.constant 0 : index
    %c0_10 = arith.constant 0 : index
    %9 = vector.load %arg5[%c0_8, %c0_9, %c0_10] : memref<1x32x16xf32, #tpu.memory_space<vmem>>, vector<1x16x16xf32>
    tpu.vector_store %arg5[%c0_8, %c0_9, %c0_10], %8 {strides = array<i32>} : memref<1x32x16xf32, #tpu.memory_space<vmem>>, vector<1x16x16xf32>,
    %10 = vector.extract_strided_slice %5 {offsets = [0, 16, 0], sizes = [1, 16, 16], strides = [1, 1, 1]} : vector<1x32x16xf32> to vector<1x16x16xf32>
    %11 = math.cos %4 : vector<1x16x16xf32>
    %12 = arith.addf %10, %11 : vector<1x16x16xf32>
    %c0_11 = arith.constant 0 : index
    %c16 = arith.constant 16 : index
    %c0_12 = arith.constant 0 : index
    %13 = vector.load %arg5[%c0_11, %c16, %c0_12] : memref<1x32x16xf32, #tpu.memory_space<vmem>>, vector<1x16x16xf32>
    tpu.vector_store %arg5[%c0_11, %c16, %c0_12], %12 {strides = array<i32>} : memref<1x32x16xf32, #tpu.memory_space<vmem>>, vector<1x16x16xf32>,
    return
  }
  func.func @transform_0(%arg0: i32, %arg1: i32) -> (i32, i32, i32) {
    %c0_i32 = arith.constant 0 : i32
    %c0_i32_0 = arith.constant 0 : i32
    return %arg0, %c0_i32, %arg1 : i32, i32, i32
  }
  func.func @transform_1(%arg0: i32, %arg1: i32) -> (i32, i32, i32) {
    %c0_i32 = arith.constant 0 : i32
    %c0_i32_0 = arith.constant 0 : i32
    return %arg0, %c0_i32, %arg1 : i32, i32, i32
  }
  func.func @transform_2(%arg0: i32, %arg1: i32) -> (i32, i32, i32) {
    %c0_i32 = arith.constant 0 : i32
    %c0_i32_0 = arith.constant 0 : i32
    %c0_i32_1 = arith.constant 0 : i32
    %c0_i32_2 = arith.constant 0 : i32
    return %c0_i32, %c0_i32_0, %c0_i32_1 : i32, i32, i32
  }
  func.func @transform_3(%arg0: i32, %arg1: i32) -> (i32, i32, i32) {
    %c0_i32 = arith.constant 0 : i32
    %c0_i32_0 = arith.constant 0 : i32
    return %arg0, %c0_i32, %arg1 : i32, i32, i32
  }
}

</mosaic_0001>

<bundles_post_ra>
// kernel: tpu_custom_call.1
= control target key start
LH: loop header
LB: loop body
LE: loop exit
PB: predicated region body
PF: predicated region fallthrough
CT: control target
= control target key end

     0   :  { %s899_s12 = smov 0   ;;  %s901_s13 = smov 0   ;;  %s1025_s0 = inlined_call_operand.vmem [shape: f32[2,32,16], index: 0, kind: input, shape index: {}]   ;;  %s1026_s1 = inlined_call_operand.vmem [shape: f32[2,1,16], index: 1, kind: input, shape index: {}]   ;;  %s1027_s2 = inlined_call_operand.vmem [shape: f32[1,16,1], index: 2, kind: input, shape index: {}]   ;;  %s1028_s3 = inlined_call_operand.vmem [shape: f32[2,32,16], index: 3, kind: output, shape index: {}]  }
   0x1   :  { %s903_s14 = smov 0  }
   0x2 LB: > { %s25_s15 = sadd.s32 1, %s866_s13  ;;  %p774_p0 = scmp.ge.s32.totalorder %s870_s14, 1  ;;  %s870_s14 = sphi %s903_s14, %s13_s14   ;;  %s866_s13 = sphi %s901_s13, %s1030_s13   ;;  %s862_s12 = sphi %s899_s12, %s1029_s12  }
   0x3   : > { %p27_p1 = scmp.ge.s32.totalorder %s25_s15, 2  ;;  %p169_p2 = scmp.lt.s32.totalorder %s870_s14, 3 }
   0x5   : > { %s1032_s15 = smov (%p27_p1, %s25_s15), 0  ;;  %p170_p3 = pnand %p774_p0, %p169_p2 }
   0x6   : > { %v228_v0 = vld [vmem:[%s1027_s2] sm:$0xff] (!%p170_p3)  ;;  %v872_v1 = vmov (!%p170_p3), 0   ;;  %v229_v2 = vld [vmem:[%s1027_s2 + $0x8] sm:$0xff] (!%p170_p3)  ;;  %p205_p4 = scmp.lt.s32.totalorder (!%p170_p3), %s862_s12, 1  ;;  %v873_v24 = vmov (!%p170_p3), 683565275  }
   0x7   : > { %173 = sbr.rel (%p170_p3) target bundleno = 231 (0xe7), region = 32  ;;  %839 = vset.pattern.permute.xlu0 (!%p170_p3), %v872_v1  ;;  %v874_v28 = vmov (!%p170_p3), 2475754826   ;;  %v875_v30 = vmov (!%p170_p3), 2131351028  }
   0x8   : > { %238 = vperm.xlu0 (!%p170_p3), %839, %v228_v0   ;;  %v876_v32 = vmov (!%p170_p3), 2102212464   ;;  %v877_v34 = vmov (!%p170_p3), 920167782   ;;  %v878_v41 = vmov (!%p170_p3), 1326507024  }
   0xc   : > { %243 = vperm.xlu0 (!%p170_p3), %839, %v229_v2  }
   0xe   : > { %s1034_s12 = smov (!%p205_p4, %s862_s12), 1 }
   0xf   : > { %s218_s22 = scalar_lea.vmem %s1026_s1, %s1034_s12  ;;  %s798_s23 = sshll.u32 %s1034_s12, 5 }
  0x10   : > { %v779_v3 = vld [vmem:[%s218_s22] ss:$0 sm:$0xff]  ;;  %s993_s26 = scalar_lea.vmem %s1025_s0, %s798_s23  ;;  %s1003_s29 = scalar_lea.vmem %s1028_s3, %s798_s23 }
  0x87   : > { %v239_v4 = vpop.permute.xlu0 %238 }
  0x88   : > { %v929_v5 = vmul.f32 %v779_v3, %v239_v4 }
  0x8a   : > { %v252_v6 = vand.u32 2147483647, %v929_v5  ;;  %v255_v7 = vand.u32 2139095040, %v929_v5  ;;  %vm254_vm14 = vcmp.lt.s32.totalorder %v929_v5, 0 }
  0x8b   : > { %v244_v8 = vpop.permute.xlu0 %243 }
  0x8c   : > { %v256_v9 = vshrl.u32 %v255_v7, 23  ;;  %v933_v10 = vmul.f32 %v779_v3, %v244_v8  ;;  %v259_v11 = vand.u32 8388607, %v252_v6  ;;  %vm253_vm15 = vcmp.le.f32.partialorder %v252_v6, 0.7853982 }
  0x8e   : > { %v780_v12 = vadd.s32 4294967169, %v256_v9  ;;  %v359_v13 = vand.u32 2139095040, %v933_v10  ;;  %v260_v15 = vor.u32 8388608, %v259_v11  ;;  %v356_v17 = vand.u32 2147483647, %v933_v10 }
  0x90   : > { %v262_v14 = vadd.s32 1, %v780_v12  ;;  %v360_v16 = vshrl.u32 %v359_v13, 23  ;;  %v939_v22 = vshll.u32 %v260_v15, 8  ;;  %v363_v26 = vand.u32 8388607, %v356_v17 }
  0x92   : > { %vm263_vm0 = vcmp.gt.s32.totalorder %v262_v14, 0  ;;  %v784_v19 = vadd.s32 4294967169, %v360_v16  ;;  %v364_v56 = vor.u32 8388608, %v363_v26 }
  0x93   : > { %v264_v18 = vsel %vm263_vm0, %v262_v14, 0  ;;  %vm358_vm0 = vcmp.lt.s32.totalorder %v933_v10, 0 }
  0x94   : > { %v265_v20 = vshrl.u32 %v264_v18, 5  ;;  %v266_v21 = vand.u32 31, %v264_v18  ;;  %v366_v27 = vadd.s32 1, %v784_v19  ;;  %v404_v7 = vshll.u32 %v364_v56, 8 }
  0x96   : > { %v267_v23 = vsub.s32 32, %v266_v21  ;;  %v269_v25 = vshll.u32 %v873_v24, %v266_v21  ;;  %v272_v29 = vshll.u32 %v874_v28, %v266_v21  ;;  %v275_v31 = vshll.u32 %v875_v30, %v266_v21 }
  0x97   : > { %v278_v33 = vshll.u32 %v876_v32, %v266_v21  ;;  %v281_v35 = vshll.u32 %v877_v34, %v266_v21  ;;  %vm284_vm1 = vcmp.lt.s32.totalorder %v265_v20, 1  ;;  %vm286_vm2 = vcmp.lt.s32.totalorder %v265_v20, 3 }
  0x98   : > { %v270_v36 = vshrl.u32 %v874_v28, %v267_v23  ;;  %v273_v37 = vshrl.u32 %v875_v30, %v267_v23  ;;  %v276_v38 = vshrl.u32 %v876_v32, %v267_v23  ;;  %v268_v39 = vshrl.u32 %v873_v24, %v267_v23 }
  0x99   : > { %v279_v40 = vshrl.u32 %v877_v34, %v267_v23  ;;  %v282_v42 = vshrl.u32 %v878_v41, %v267_v23  ;;  %vm367_vm3 = vcmp.gt.s32.totalorder %v366_v27, 0  ;;  %vm287_vm4 = vcmp.lt.s32.totalorder %v265_v20, 4 }
  0x9a   : > { %v271_v43 = vor.u32 %v270_v36, %v269_v25  ;;  %v274_v44 = vor.u32 %v273_v37, %v272_v29  ;;  %v277_v45 = vor.u32 %v276_v38, %v275_v31  ;;  %v368_v48 = vsel %vm367_vm3, %v366_v27, 0 }
  0x9b   : > { %v280_v46 = vor.u32 %v279_v40, %v278_v33  ;;  %v283_v47 = vor.u32 %v282_v42, %v281_v35  ;;  %vm285_vm5 = vcmp.lt.s32.totalorder %v265_v20, 2  ;;  %v370_v59 = vand.u32 31, %v368_v48 }
  0x9c   : > { %v288_v49 = vsel %vm284_vm1, %v268_v39, %v271_v43  ;;  %v289_v50 = vsel %vm287_vm4, %v277_v45, 2102212464  ;;  %v292_v51 = vsel %vm284_vm1, %v271_v43, %v274_v44  ;;  %v296_v52 = vsel %vm284_vm1, %v274_v44, %v277_v45 }
  0x9d   : > { %v290_v53 = vsel %vm286_vm2, %v274_v44, %v289_v50  ;;  %v293_v54 = vsel %vm287_vm4, %v280_v46, 920167782  ;;  %v297_v55 = vsel %vm287_vm4, %v283_v47, 1326507024  ;;  %v369_v3 = vshrl.u32 %v368_v48, 5 }
  0x9e   : > { %v294_v57 = vsel %vm286_vm2, %v277_v45, %v293_v54  ;;  %v298_v58 = vsel %vm286_vm2, %v280_v46, %v297_v55  ;;  %v291_v60 = vsel %vm285_vm5, %v288_v49, %v290_v53  ;;  %v371_v4 = vsub.s32 32, %v370_v59 }
  0x9f   : > { %v295_v61 = vsel %vm285_vm5, %v292_v51, %v294_v57  ;;  %v299_v62 = vsel %vm285_vm5, %v296_v52, %v298_v58  ;;  %v307_v8 = vmul.u32 %v939_v22, %v291_v60  ;;  %v373_v9 = vshll.u32 %v873_v24, %v370_v59 }
  0xa0   : > { %v952_v63 = vmul.u32.u64.low %v939_v22, %v299_v62  ;;  %v953_v0 = vmul.u32.u64.high %v939_v22, %v299_v62, %v952_v63  ;;  %v956_v1 = vmul.u32.u64.low %v939_v22, %v295_v61  ;;  %v957_v2 = vmul.u32.u64.high %v939_v22, %v295_v61, %v956_v1 }
  0xa1   : > { %v376_v11 = vshll.u32 %v874_v28, %v370_v59  ;;  %v379_v12 = vshll.u32 %v875_v30, %v370_v59  ;;  %v374_v13 = vshrl.u32 %v874_v28, %v371_v4  ;;  %v377_v14 = vshrl.u32 %v875_v30, %v371_v4 }
  0xa2   : > { %v380_v15 = vshrl.u32 %v876_v32, %v371_v4  ;;  %v382_v16 = vshll.u32 %v876_v32, %v370_v59  ;;  %vm309_vm6 = vc.u32 %v953_v0, %v956_v1  ;;  %v310_v18 = vadd.s32 1, %v957_v2 }
  0xa3   : > { %v383_v19 = vshrl.u32 %v877_v34, %v371_v4  ;;  %v385_v20 = vshll.u32 %v877_v34, %v370_v59  ;;  %v375_v21 = vor.u32 %v374_v13, %v373_v9  ;;  %v378_v23 = vor.u32 %v377_v14, %v376_v11 }
  0xa4   : > { %v381_v25 = vor.u32 %v380_v15, %v379_v12  ;;  %v386_v26 = vshrl.u32 %v878_v41, %v371_v4  ;;  %v311_v22 = vsel %vm309_vm6, %v310_v18, %v957_v2  ;;  %vm388_vm7 = vcmp.lt.s32.totalorder %v369_v3, 1 }
  0xa5   : > { %v384_v27 = vor.u32 %v383_v19, %v382_v16  ;;  %vm391_vm8 = vcmp.lt.s32.totalorder %v369_v3, 4  ;;  %v312_v28 = vadd.s32 %v311_v22, %v307_v8  ;;  %vm390_vm9 = vcmp.lt.s32.totalorder %v369_v3, 3 }
  0xa6   : > { %v387_v29 = vor.u32 %v386_v26, %v385_v20  ;;  %v393_v30 = vsel %vm391_vm8, %v381_v25, 2102212464  ;;  %v372_v31 = vshrl.u32 %v873_v24, %v371_v4  ;;  %v396_v32 = vsel %vm388_vm7, %v375_v21, %v378_v23 }
  0xa7   : > { %v397_v33 = vsel %vm391_vm8, %v384_v27, 920167782  ;;  %v400_v35 = vsel %vm388_vm7, %v378_v23, %v381_v25  ;;  %v313_v36 = vadd.s32 536870912, %v312_v28  ;;  %vm389_vm10 = vcmp.lt.s32.totalorder %v369_v3, 2 }
  0xa8   : > { %v398_v34 = vsel %vm390_vm9, %v381_v25, %v397_v33  ;;  %v401_v37 = vsel %vm391_vm8, %v387_v29, 1326507024  ;;  %v392_v38 = vsel %vm388_vm7, %v372_v31, %v375_v21  ;;  %v394_v39 = vsel %vm390_vm9, %v378_v23, %v393_v30 }
  0xa9   : > { %v399_v40 = vsel %vm389_vm10, %v396_v32, %v398_v34  ;;  %v402_v41 = vsel %vm390_vm9, %v384_v27, %v401_v37  ;;  %v314_v42 = vshrl.u32 %v313_v36, 30  ;;  %v395_v48 = vsel %vm389_vm10, %v392_v38, %v394_v39 }
  0xaa   : > { %v403_v43 = vsel %vm389_vm10, %v400_v35, %v402_v41  ;;  %v967_v44 = vmul.u32.u64.low %v404_v7, %v399_v40  ;;  %v968_v45 = vmul.u32.u64.high %v404_v7, %v399_v40, %v967_v44  ;;  %v411_v51 = vmul.u32 %v404_v7, %v395_v48 }
  0xab   : > { %v970_v46 = vmul.u32.u64.low %v404_v7, %v403_v43  ;;  %v971_v47 = vmul.u32.u64.high %v404_v7, %v403_v43, %v970_v46  ;;  %v315_v24 = vshll.u32 %v314_v42, 30  ;;  %v308_v63 = vadd.s32 %v956_v1, %v953_v0 }
  0xac   : > { %v414_v50 = vadd.s32 1, %v968_v45  ;;  %v338_v21 = vsub.s32 4, %v314_v42  ;;  %vm357_vm1 = vcmp.le.f32.partialorder %v356_v17, 0.7853982  ;;  %vm344_vm8 = vweird.f32 %v929_v5 }
  0xad   : > { %v316_v49 = vsub.s32 %v312_v28, %v315_v24  ;;  %vm413_vm11 = vc.u32 %v971_v47, %v967_v44  ;;  %v412_v0 = vadd.s32 %v967_v44, %v971_v47  ;;  %vm462_vm9 = vcmask 130048  }
  0xae   : > { %v415_v53 = vsel %vm413_vm11, %v414_v50, %v968_v45  ;;  %v339_v30 = vsel %vm254_vm14, %v338_v21, %v314_v42 }
  0xaf   : > { %v318_v52 = vsub.s32 0, %v316_v49  ;;  %v416_v54 = vadd.s32 %v415_v53, %v411_v51  ;;  %v341_v35 = vsel %vm253_vm15, 0, %v339_v30  ;;  %v248_v51 = vld [vmem:[%s993_s26] sm:$0xff] }
  0xb0   : > { %v345_v38 = vadd.s32 3, %v341_v35  ;;  %v558_v41 = vand.u32 3, %v341_v35 }
  0xb1   : > { %v781_v55 = vmin.u32 %v318_v52, %v316_v49  ;;  %v417_v56 = vadd.s32 536870912, %v416_v54  ;;  %v250_v52 = vld [vmem:[%s993_s26 + $0x10] sm:$0xff] }
  0xb2   : > { %v346_v6 = vand.u32 3, %v345_v38  ;;  %vm563_vm2 = vcmp.eq.s32.totalorder %v558_v41, 2  ;;  %vm560_vm5 = vcmp.eq.s32.totalorder %v558_v41, 0  ;;  %vm559_vm7 = vcmp.lt.s32.totalorder %v558_v41, 2 }
  0xb3   : > { %v320_v57 = vclz %v781_v55  ;;  %v418_v58 = vshrl.u32 %v417_v56, 30 }
  0xb4   : > { %vm351_vm3 = vcmp.eq.s32.totalorder %v346_v6, 2  ;;  %vm348_vm4 = vcmp.eq.s32.totalorder %v346_v6, 0  ;;  %vm347_vm6 = vcmp.lt.s32.totalorder %v346_v6, 2 }
  0xb5   : > { %v782_v59 = vadd.s32 4294967294, %v320_v57  ;;  %v419_v60 = vshll.u32 %v418_v58, 30  ;;  %v442_v40 = vsub.s32 4, %v418_v58 }
  0xb7   : > { %vm783_vm12 = vcmp.lt.s32.totalorder %v782_v59, 0  ;;  %v420_v62 = vsub.s32 %v416_v54, %v419_v60  ;;  %v443_v44 = vsel %vm358_vm0, %v442_v40, %v418_v58 }
  0xb8   : > { %v323_v61 = vsel %vm783_vm12, 0, %v782_v59  ;;  %v445_v17 = vsel %vm357_vm1, 0, %v443_v44 }
  0xb9   : > { %v324_v2 = vsub.s32 32, %v323_v61  ;;  %v328_v3 = vsub.s32 4294967266, %v323_v61  ;;  %v422_v4 = vsub.s32 0, %v420_v62  ;;  %v325_v7 = vshll.u32 %v316_v49, %v323_v61 }
  0xba   : > { %v449_v57 = vadd.s32 3, %v445_v17 }
  0xbb   : > { %v326_v8 = vshrl.u32 %v308_v63, %v324_v2  ;;  %v329_v9 = vadd.s32 127, %v328_v3  ;;  %v785_v11 = vmin.u32 %v422_v4, %v420_v62 }
  0xbd   : > { %v327_v12 = vor.u32 %v326_v8, %v325_v7  ;;  %v330_v13 = vshll.u32 %v329_v9, 23  ;;  %v424_v14 = vclz %v785_v11  ;;  %v249_v9 = vld [vmem:[%s993_s26 + $0x8] sm:$0xff]  ;;  %v251_v11 = vld [vmem:[%s993_s26 + $0x18] sm:$0xff] }
  0xbf   : > { %v331_v15 = vor.u32 4788187, %v330_v13  ;;  %v786_v16 = vadd.s32 4294967294, %v424_v14  ;;  %v334_v19 = vcvt.s32.f32 %v327_v12 }
  0xc1   : > { %v332_v18 = vand.u32 2147483647, %v331_v15  ;;  %vm787_vm13 = vcmp.lt.s32.totalorder %v786_v16, 0 }
  0xc2   : > { %v427_v23 = vsel %vm787_vm13, 0, %v786_v16 }
  0xc3   : > { %v335_v20 = vmul.f32 %v334_v19, %v332_v18  ;;  %v428_v1 = vsub.s32 32, %v427_v23  ;;  %v432_v25 = vsub.s32 4294967266, %v427_v23  ;;  %v429_v22 = vshll.u32 %v420_v62, %v427_v23 }
  0xc4   : > { %v661_v62 = vand.u32 3, %v445_v17 }
  0xc5   : > { %v336_v26 = vxor.u32 2147483648, %v335_v20  ;;  %v430_v27 = vshrl.u32 %v412_v0, %v428_v1  ;;  %v433_v28 = vadd.s32 127, %v432_v25 }
  0xc6   : > { %vm666_vm11 = vcmp.eq.s32.totalorder %v661_v62, 2  ;;  %vm663_vm13 = vcmp.eq.s32.totalorder %v661_v62, 0 }
  0xc7   : > { %v337_v29 = vsel %vm254_vm14, %v336_v26, %v335_v20  ;;  %v431_v32 = vor.u32 %v430_v27, %v429_v22  ;;  %v434_v33 = vshll.u32 %v433_v28, 23 }
  0xc8   : > { %v340_v31 = vsel %vm253_vm15, %v929_v5, %v337_v29  ;;  %v450_v5 = vand.u32 3, %v449_v57  ;;  %vm662_vm15 = vcmp.lt.s32.totalorder %v661_v62, 2 }
  0xc9   : > { %840 = vcosq.f32 %v340_v31  ;;  %v435_v36 = vor.u32 4788187, %v434_v33  ;;  %v438_v37 = vcvt.s32.f32 %v431_v32 }
  0xca   : > { %842 = vsinq.f32 %v340_v31  ;;  %vm455_vm10 = vcmp.eq.s32.totalorder %v450_v5, 2  ;;  %vm452_vm12 = vcmp.eq.s32.totalorder %v450_v5, 0  ;;  %vm451_vm14 = vcmp.lt.s32.totalorder %v450_v5, 2 }
  0xcb   : > { %v436_v34 = vand.u32 2147483647, %v435_v36 }
  0xcd   : > { %v439_v39 = vmul.f32 %v438_v37, %v436_v34 }
  0xcf   : > { %v440_v43 = vxor.u32 2147483648, %v439_v39 }
  0xd1   : > { %v441_v42 = vsel %vm358_vm0, %v440_v43, %v439_v39  ;;  %vm448_vm0 = vweird.f32 %v933_v10 }
  0xd2   : > { %v444_v46 = vsel %vm357_vm1, %v933_v10, %v441_v42 }
  0xd3   : > { %v841_v45 = vpop.eup %840  ;;  %844 = vcosq.f32 %v444_v46 }
  0xd4   : > { %v843_v47 = vpop.eup %842  ;;  %v352_v24 = vxor.u32 2147483648, %v841_v45  ;;  %846 = vsinq.f32 %v444_v46 }
  0xd5   : > { %v349_v48 = vxor.u32 2147483648, %v843_v47 }
  0xd6   : > { %v353_v49 = vsel %vm351_vm3, %v352_v24, %v843_v47  ;;  %v565_v50 = vsel %vm563_vm2, %v352_v24, %v843_v47 }
  0xd7   : > { %v350_v53 = vsel %vm348_vm4, %v841_v45, %v349_v48  ;;  %v562_v54 = vsel %vm560_vm5, %v841_v45, %v349_v48 }
  0xd8   : > { %v354_v55 = vsel %vm347_vm6, %v350_v53, %v353_v49  ;;  %v566_v56 = vsel %vm559_vm7, %v562_v54, %v565_v50 }
  0xd9   : > { %v355_v58 = vsel %vm344_vm8, nan, %v354_v55  ;;  %v567_v59 = vsel %vm344_vm8, nan, %v566_v56 }
  0xda   : > { %v460_v60 = vadd.f32 %v355_v58, %v248_v51  ;;  %v671_v61 = vadd.f32 %v567_v59, %v250_v52 }
  0xdc   : > { %463 = vst.msk [vmem:[%s1003_s29] sm:$0xff] %vm462_vm9, %v460_v60  ;;  %673 = vst.msk [vmem:[%s1003_s29 + $0x10] sm:$0xff] %vm462_vm9, %v671_v61 }
  0xdd   : > { %v845_v63 = vpop.eup %844 }
  0xde   : > { %v847_v2 = vpop.eup %846  ;;  %v456_v3 = vxor.u32 2147483648, %v845_v63 }
  0xdf   : > { %v453_v4 = vxor.u32 2147483648, %v847_v2 }
  0xe0   : > { %v457_v7 = vsel %vm455_vm10, %v456_v3, %v847_v2  ;;  %v668_v8 = vsel %vm666_vm11, %v456_v3, %v847_v2 }
  0xe1   : > { %v454_v12 = vsel %vm452_vm12, %v845_v63, %v453_v4  ;;  %v665_v13 = vsel %vm663_vm13, %v845_v63, %v453_v4 }
  0xe2   : > { %v458_v14 = vsel %vm451_vm14, %v454_v12, %v457_v7  ;;  %v669_v15 = vsel %vm662_vm15, %v665_v13, %v668_v8 }
  0xe3   : > { %v459_v16 = vsel %vm448_vm0, nan, %v458_v14  ;;  %v670_v18 = vsel %vm448_vm0, nan, %v669_v15 }
  0xe4   : > { %v461_v19 = vadd.f32 %v459_v16, %v249_v9  ;;  %v672_v20 = vadd.f32 %v670_v18, %v251_v11 }
  0xe6   : > { %464 = vst.msk [vmem:[%s1003_s29 + $0x8] sm:$0xff] %vm462_vm9, %v461_v19  ;;  %674 = vst.msk [vmem:[%s1003_s29 + $0x18] sm:$0xff] %vm462_vm9, %v672_v20 }
  0xe7 PF: > { %s13_s14 = sadd.s32 1, %s870_s14   ;;  %s1029_s12 = smov %s866_s13 }
  0xe8   : > { %p10_p5 = scmp.ge.s32.totalorder %s13_s14, 4   ;;  %s1030_s13 = smov %s1032_s15 }
  0xea   :  { %12 = sbr.rel (!%p10_p5) target bundleno = 2 (0x2), region = 65 }

</bundles_post_ra>
